<compile_context>
chip_gen: v7x
topology: tpu7x:2x2x1
jax: 0.10.0
libtpu: 0.0.40
codegen_flags: <defaults>
</compile_context>

<pallas_src>
import math
from functools import partial

import jax
import jax.numpy as jnp
from jax.experimental import pallas as pl
from jax.experimental.pallas import tpu as pltpu

_BN_EPS = 1e-5


def _round_up(x, m):
    return (x + m - 1) // m * m


# --------------------------------------------------------------------------
# Pallas kernels
# --------------------------------------------------------------------------

def _conv_mm_kernel(a_ref, b_ref, o_ref, sum_ref, sq_ref, acc_ref):
    """bf16 matmul tile with f32 accumulator + fused BN-stats epilogue.

    Grid is (N-tiles, M-tiles, K-tiles), K innermost.  The output tile and the
    per-channel sum / sum-of-squares are stored only on the last K step; the
    stats block (index (0, j)) is revisited across the whole M/K sweep of one
    N tile, so it accumulates in resident VMEM.
    """
    i = pl.program_id(1)            # M-tile index
    k = pl.program_id(2)            # K-tile index (reduction, innermost)
    nk = pl.num_programs(2)

    @pl.when(k == 0)
    def _():
        acc_ref[...] = jnp.zeros_like(acc_ref)

    acc_ref[...] += jnp.dot(a_ref[...], b_ref[...],
                            preferred_element_type=jnp.float32)

    @pl.when(jnp.logical_and(i == 0, k == 0))
    def _():
        sum_ref[...] = jnp.zeros_like(sum_ref)
        sq_ref[...] = jnp.zeros_like(sq_ref)

    @pl.when(k == nk - 1)
    def _():
        acc = acc_ref[...]
        o_ref[...] = acc.astype(o_ref.dtype)
        sum_ref[...] += jnp.sum(acc, axis=0, keepdims=True)
        sq_ref[...] += jnp.sum(acc * acc, axis=0, keepdims=True)


def _bn_act_kernel(x_ref, s_ref, b_ref, o_ref, *, relu):
    y = x_ref[...] * s_ref[...] + b_ref[...]
    if relu:
        y = jnp.maximum(y, 0.0)
    o_ref[...] = y


def _bn_add_relu_kernel(x_ref, r_ref, s_ref, b_ref, o_ref):
    o_ref[...] = jnp.maximum(
        x_ref[...] * s_ref[...] + b_ref[...] + r_ref[...], 0.0)


# --------------------------------------------------------------------------
# Matmul (+ fused BN statistics) wrapper
# --------------------------------------------------------------------------

def _pick_tiles(M, K, N):
    """Adaptive tiles; full-K / full-M blocks when small (minimal padding)."""
    Np = _round_up(N, 128)
    if Np <= 512:
        tn = Np
    else:
        tn = 256                    # >=2 N tiles for megacore on big layers
        Np = _round_up(Np, tn)
    Mp = _round_up(M, 8)
    if Mp <= 512:
        tm = Mp
    else:
        tm = 256
        Mp = _round_up(Mp, tm)
    Kp = _round_up(K, 8)
    if Kp <= 2048:
        tk = Kp                     # single K step when it fits comfortably
    else:
        tk = 512
        Kp = _round_up(Kp, tk)
    return Mp, Kp, Np, tm, tk, tn


def matmul_bn_stats(a, b):
    """a: (M, K), b: (K, N) -> (out (Mp, Np) f32, sum (1, Np), sumsq (1, Np)).

    Operands are cast to bf16; accumulation is f32.  Zero padding keeps the
    padded rows/cols exactly zero, so per-channel sums are unaffected.
    """
    M, K = a.shape
    K2, N = b.shape
    assert K == K2
    Mp, Kp, Np, tm, tk, tn = _pick_tiles(M, K, N)
    a_p = jnp.pad(a.astype(jnp.bfloat16), ((0, Mp - M), (0, Kp - K)))
    b_p = jnp.pad(b.astype(jnp.bfloat16), ((0, Kp - K), (0, Np - N)))
    out, s, q = pl.pallas_call(
        _conv_mm_kernel,
        out_shape=(jax.ShapeDtypeStruct((Mp, Np), jnp.float32),
                   jax.ShapeDtypeStruct((1, Np), jnp.float32),
                   jax.ShapeDtypeStruct((1, Np), jnp.float32)),
        grid_spec=pltpu.PrefetchScalarGridSpec(
            num_scalar_prefetch=0,
            grid=(Np // tn, Mp // tm, Kp // tk),
            in_specs=[pl.BlockSpec((tm, tk), lambda j, i, k: (i, k)),
                      pl.BlockSpec((tk, tn), lambda j, i, k: (k, j))],
            out_specs=(pl.BlockSpec((tm, tn), lambda j, i, k: (i, j)),
                       pl.BlockSpec((1, tn), lambda j, i, k: (0, j)),
                       pl.BlockSpec((1, tn), lambda j, i, k: (0, j))),
            scratch_shapes=[pltpu.VMEM((tm, tn), jnp.float32)]),
        compiler_params=pltpu.CompilerParams(
            dimension_semantics=("parallel", "arbitrary", "arbitrary")),
    )(a_p, b_p)
    return out, s, q


# --------------------------------------------------------------------------
# Fused BN apply (+ residual) (+ ReLU)
# --------------------------------------------------------------------------

def bn_apply(conv_out, s, q, M, C, residual=None, relu=True, tr_max=1024):
    """Train-mode BN (gamma=1, beta=0): y = x*scale + shift (+res), opt ReLU.

    conv_out: (Mp, Np) padded conv slab; s/q: per-channel sum / sum-of-squares
    over the M valid rows.  Tiles are lane-packed to 128 lanes when C < 128.
    Returns (M, C) f32.
    """
    mean = s[0, :C] / M
    var = q[0, :C] / M - mean * mean          # biased (train-mode) variance
    scale = jax.lax.rsqrt(var + _BN_EPS)
    shift = -mean * scale

    x2 = conv_out[:M, :C]
    f = 128 // C if (C < 128 and 128 % C == 0) else 1     # lane-pack factor
    W = f * C
    Mq = _round_up(M, f)
    R = Mq // f
    tr = R if R <= tr_max else 256
    Rp = _round_up(R, tr)

    def _pack(m2d):
        m2d = jnp.pad(m2d.astype(jnp.float32),
                      ((0, Mq - m2d.shape[0]), (0, 0)))
        m2d = m2d.reshape(R, W)
        return jnp.pad(m2d, ((0, Rp - R), (0, 0)))

    xw = _pack(x2)
    sc = jnp.tile(scale, f).reshape(1, W).astype(jnp.float32)
    sh = jnp.tile(shift, f).reshape(1, W).astype(jnp.float32)

    row_spec = pl.BlockSpec((tr, W), lambda i: (i, 0))
    vec_spec = pl.BlockSpec((1, W), lambda i: (0, 0))

    if residual is None:
        out = pl.pallas_call(
            partial(_bn_act_kernel, relu=relu),
            out_shape=jax.ShapeDtypeStruct((Rp, W), jnp.float32),
            grid_spec=pltpu.PrefetchScalarGridSpec(
                num_scalar_prefetch=0, grid=(Rp // tr,),
                in_specs=[row_spec, vec_spec, vec_spec],
                out_specs=row_spec),
            compiler_params=pltpu.CompilerParams(
                dimension_semantics=("parallel",)),
        )(xw, sc, sh)
    else:
        rw = _pack(residual)
        out = pl.pallas_call(
            _bn_add_relu_kernel,
            out_shape=jax.ShapeDtypeStruct((Rp, W), jnp.float32),
            grid_spec=pltpu.PrefetchScalarGridSpec(
                num_scalar_prefetch=0, grid=(Rp // tr,),
                in_specs=[row_spec, row_spec, vec_spec, vec_spec],
                out_specs=row_spec),
            compiler_params=pltpu.CompilerParams(
                dimension_semantics=("parallel",)),
        )(xw, rw, sc, sh)
    return out[:R].reshape(Mq, C)[:M]


# --------------------------------------------------------------------------
# Conv wrappers (im2col glue in JAX, matmul/elementwise in Pallas)
# --------------------------------------------------------------------------

def conv3x3_mm(x, w, stride):
    """3x3 conv, padding=1, no bias.  x: NHWC f32, w: (3,3,Cin,Cout) f32."""
    N, H, W, Cin = x.shape
    Cout = w.shape[-1]
    Ho = (H + 2 - 3) // stride + 1
    Wo = (W + 2 - 3) // stride + 1
    xp = jnp.pad(x, ((0, 0), (1, 1), (1, 1), (0, 0))).astype(jnp.bfloat16)
    cols = [xp[:, dh:dh + stride * Ho:stride, dw:dw + stride * Wo:stride, :]
            for dh in range(3) for dw in range(3)]
    a = jnp.concatenate(cols, axis=-1).reshape(N * Ho * Wo, 9 * Cin)
    wf = w.reshape(9 * Cin, Cout)              # (dh, dw, cin) row order
    return matmul_bn_stats(a, wf)


def basic_block(x, p):
    """relu(bn2(conv2(relu(bn1(conv1(x))))) + shortcut(x)), channels-last."""
    N, H, W, Cin = x.shape
    stride = p["stride"]
    planes = p["w1"].shape[-1]
    Ho = (H + 2 - 3) // stride + 1
    Wo = (W + 2 - 3) // stride + 1
    M = N * Ho * Wo

    o1, s1, q1 = conv3x3_mm(x, p["w1"], stride)
    h = bn_apply(o1, s1, q1, M, planes, relu=True)
    o2, s2, q2 = conv3x3_mm(h.reshape(N, Ho, Wo, planes), p["w2"], 1)

    if "ws" in p:                              # 1x1 conv + BN shortcut
        xs = x[:, ::stride, ::stride, :].reshape(M, Cin)
        os_, ss, qs = matmul_bn_stats(xs, p["ws"])
        sc = bn_apply(os_, ss, qs, M, planes, relu=False)
    else:                                      # identity shortcut
        sc = x.reshape(M, planes)

    out = bn_apply(o2, s2, q2, M, planes, residual=sc, relu=True)
    return out.reshape(N, Ho, Wo, planes)


def basic_block_forward(blocks, x_nchw):
    x = jnp.transpose(x_nchw.astype(jnp.float32), (0, 2, 3, 1))   # NCHW->NHWC
    for p in blocks:
        x = basic_block(x, p)
    return jnp.transpose(x, (0, 3, 1, 2))                         # ->NCHW


# --------------------------------------------------------------------------
# Pure-JAX reference (f32, HIGHEST precision) for correctness checking
# --------------------------------------------------------------------------

def _ref_bn(x):
    mean = jnp.mean(x, axis=(0, 1, 2), keepdims=True)
    var = jnp.mean(jnp.square(x - mean), axis=(0, 1, 2), keepdims=True)
    return (x - mean) / jnp.sqrt(var + _BN_EPS)


def _ref_conv3x3(x, w, stride):
    return jax.lax.conv_general_dilated(
        x, w, window_strides=(stride, stride), padding=((1, 1), (1, 1)),
        dimension_numbers=("NHWC", "HWIO", "NHWC"),
        precision=jax.lax.Precision.HIGHEST)


def _ref_conv1x1(x, w, stride):
    return jax.lax.conv_general_dilated(
        x, w.reshape(1, 1, *w.shape), window_strides=(stride, stride),
        padding="VALID", dimension_numbers=("NHWC", "HWIO", "NHWC"),
        precision=jax.lax.Precision.HIGHEST)


def ref_basic_block(x, p):
    stride = p["stride"]
    h = jax.nn.relu(_ref_bn(_ref_conv3x3(x, p["w1"], stride)))
    g = _ref_bn(_ref_conv3x3(h, p["w2"], 1))
    sc = _ref_bn(_ref_conv1x1(x, p["ws"], stride)) if "ws" in p else x
    return jax.nn.relu(g + sc)


def ref_forward(blocks, x_nchw):
    x = jnp.transpose(x_nchw.astype(jnp.float32), (0, 2, 3, 1))
    for p in blocks:
        x = ref_basic_block(x, p)
    return jnp.transpose(x, (0, 3, 1, 2))


# --------------------------------------------------------------------------
# Parameter init (kaiming-normal-style, no bias; BN gamma=1, beta=0 implicit)
# --------------------------------------------------------------------------

def _kaiming3x3(key, cin, cout):
    std = math.sqrt(2.0 / (9 * cin))
    return jax.random.normal(key, (3, 3, cin, cout), jnp.float32) * std


def _kaiming1x1(key, cin, cout):
    std = math.sqrt(2.0 / cin)
    return jax.random.normal(key, (cin, cout), jnp.float32) * std


if __name__ == "__main__":
    key = jax.random.PRNGKey(0)
    ks = jax.random.split(key, 6)
    in_planes, planes = 32, 64

    # Block A: downsampling BasicBlock (stride=2, 1x1-conv + BN shortcut).
    pA = {"stride": 2,
          "w1": _kaiming3x3(ks[0], in_planes, planes),
          "w2": _kaiming3x3(ks[1], planes, planes),
          "ws": _kaiming1x1(ks[2], in_planes, planes)}
    # Block B: identity-shortcut BasicBlock (stride=1, in==out planes).
    pB = {"stride": 1,
          "w1": _kaiming3x3(ks[3], planes, planes),
          "w2": _kaiming3x3(ks[4], planes, planes)}

    x_nchw = jax.random.normal(ks[5], (2, in_planes, 16, 16), jnp.float32)

    out = basic_block_forward([pA, pB], x_nchw)
    out = jax.block_until_ready(out)
    assert out.shape == (2, planes, 8, 8), out.shape
    assert bool(jnp.all(jnp.isfinite(out)))

    ref = ref_forward([pA, pB], x_nchw)
    err = float(jnp.max(jnp.abs(out - ref)))
    ref_scale = float(jnp.max(jnp.abs(ref))) + 1e-6
    assert err / ref_scale < 0.1, (err, ref_scale)   # bf16-operand tolerance

    print("KERNEL_OK")
</pallas_src>

<mosaic_0001>
module attributes {stable_mosaic.version = 11 : i64} {
  func.func @_conv_mm_kernel(%arg0: i32, %arg1: i32, %arg2: i32, %arg3: memref<128x288xbf16, #tpu.memory_space<vmem>>, %arg4: memref<288x128xbf16, #tpu.memory_space<vmem>>, %arg5: memref<128x128xf32, #tpu.memory_space<vmem>>, %arg6: memref<1x128xf32, #tpu.memory_space<vmem>>, %arg7: memref<1x128xf32, #tpu.memory_space<vmem>>, %arg8: memref<128x128xf32, #tpu.memory_space<vmem>>) attributes {dimension_semantics = [#tpu.dimension_semantics<parallel>, #tpu.dimension_semantics<arbitrary>, #tpu.dimension_semantics<arbitrary>], iteration_bounds = array<i64: 1, 1, 1>, scalar_prefetch = 0 : i64, scratch_operands = 1 : i64, tpu.core_type = #tpu.core_type<tc>, window_params = [{transform_indices = @transform_0, window_bounds = array<i64: 128, 288>}, {transform_indices = @transform_1, window_bounds = array<i64: 288, 128>}, {transform_indices = @transform_2, window_bounds = array<i64: 128, 128>}, {transform_indices = @transform_3, window_bounds = array<i64: 1, 128>}, {transform_indices = @transform_4, window_bounds = array<i64: 1, 128>}]} {
    %c0_i32 = arith.constant 0 : i32
    %0 = arith.cmpi eq, %arg2, %c0_i32 : i32
    %1 = arith.extui %0 : i1 to i32
    %c0_i32_0 = arith.constant 0 : i32
    %2 = arith.cmpi ne, %1, %c0_i32_0 : i32
    scf.if %2 {
      %cst_13 = arith.constant 0.000000e+00 : f32
      %17 = vector.broadcast %cst_13 : f32 to vector<128x128xf32>
      %c0_14 = arith.constant 0 : index
      %c0_15 = arith.constant 0 : index
      %18 = vector.load %arg8[%c0_14, %c0_15] : memref<128x128xf32, #tpu.memory_space<vmem>>, vector<128x128xf32>
      tpu.vector_store %arg8[%c0_14, %c0_15], %17 {strides = array<i32>} : memref<128x128xf32, #tpu.memory_space<vmem>>, vector<128x128xf32>,
    } else {
    }
    %c0 = arith.constant 0 : index
    %c0_1 = arith.constant 0 : index
    %3 = vector.load %arg8[%c0, %c0_1] : memref<128x128xf32, #tpu.memory_space<vmem>>, vector<128x128xf32>
    %c0_2 = arith.constant 0 : index
    %c0_3 = arith.constant 0 : index
    %4 = vector.load %arg3[%c0_2, %c0_3] : memref<128x288xbf16, #tpu.memory_space<vmem>>, vector<128x288xbf16>
    %c0_4 = arith.constant 0 : index
    %c0_5 = arith.constant 0 : index
    %5 = vector.load %arg4[%c0_4, %c0_5] : memref<288x128xbf16, #tpu.memory_space<vmem>>, vector<288x128xbf16>
    %cst = arith.constant dense<0.000000e+00> : vector<128x128xf32>
    %6 = tpu.matmul %4, %5, %cst {dimension_numbers = #tpu.dot_dimension_numbers<[1], [0], [0], [1], [0, 0, 1, 1], [], []>} : vector<128x288xbf16>, vector<288x128xbf16>, vector<128x128xf32> -> vector<128x128xf32>
    %7 = arith.addf %3, %6 : vector<128x128xf32>
    %c0_6 = arith.constant 0 : index
    %c0_7 = arith.constant 0 : index
    %8 = vector.load %arg8[%c0_6, %c0_7] : memref<128x128xf32, #tpu.memory_space<vmem>>, vector<128x128xf32>
    tpu.vector_store %arg8[%c0_6, %c0_7], %7 {strides = array<i32>} : memref<128x128xf32, #tpu.memory_space<vmem>>, vector<128x128xf32>,
    %c0_i32_8 = arith.constant 0 : i32
    %9 = arith.cmpi eq, %arg1, %c0_i32_8 : i32
    %c0_i32_9 = arith.constant 0 : i32
    %10 = arith.cmpi eq, %arg2, %c0_i32_9 : i32
    %11 = arith.andi %9, %10 : i1
    %12 = arith.extui %11 : i1 to i32
    %c0_i32_10 = arith.constant 0 : i32
    %13 = arith.cmpi ne, %12, %c0_i32_10 : i32
    scf.if %13 {
      %cst_13 = arith.constant 0.000000e+00 : f32
      %17 = vector.broadcast %cst_13 : f32 to vector<1x128xf32>
      %c0_14 = arith.constant 0 : index
      %c0_15 = arith.constant 0 : index
      %18 = vector.load %arg6[%c0_14, %c0_15] : memref<1x128xf32, #tpu.memory_space<vmem>>, vector<1x128xf32>
      tpu.vector_store %arg6[%c0_14, %c0_15], %17 {strides = array<i32>} : memref<1x128xf32, #tpu.memory_space<vmem>>, vector<1x128xf32>,
      %cst_16 = arith.constant 0.000000e+00 : f32
      %19 = vector.broadcast %cst_16 : f32 to vector<1x128xf32>
      %c0_17 = arith.constant 0 : index
      %c0_18 = arith.constant 0 : index
      %20 = vector.load %arg7[%c0_17, %c0_18] : memref<1x128xf32, #tpu.memory_space<vmem>>, vector<1x128xf32>
      tpu.vector_store %arg7[%c0_17, %c0_18], %19 {strides = array<i32>} : memref<1x128xf32, #tpu.memory_space<vmem>>, vector<1x128xf32>,
    } else {
    }
    %c0_i32_11 = arith.constant 0 : i32
    %14 = arith.cmpi eq, %arg2, %c0_i32_11 : i32
    %15 = arith.extui %14 : i1 to i32
    %c0_i32_12 = arith.constant 0 : i32
    %16 = arith.cmpi ne, %15, %c0_i32_12 : i32
    scf.if %16 {
      %c0_13 = arith.constant 0 : index
      %c0_14 = arith.constant 0 : index
      %17 = vector.load %arg8[%c0_13, %c0_14] : memref<128x128xf32, #tpu.memory_space<vmem>>, vector<128x128xf32>
      %c0_15 = arith.constant 0 : index
      %c0_16 = arith.constant 0 : index
      %18 = vector.load %arg5[%c0_15, %c0_16] : memref<128x128xf32, #tpu.memory_space<vmem>>, vector<128x128xf32>
      tpu.vector_store %arg5[%c0_15, %c0_16], %17 {strides = array<i32>} : memref<128x128xf32, #tpu.memory_space<vmem>>, vector<128x128xf32>,
      %c0_17 = arith.constant 0 : index
      %c0_18 = arith.constant 0 : index
      %19 = vector.load %arg6[%c0_17, %c0_18] : memref<1x128xf32, #tpu.memory_space<vmem>>, vector<1x128xf32>
      %cst_19 = arith.constant dense<0.000000e+00> : vector<128xf32>
      %20 = vector.multi_reduction <add>, %17, %cst_19 [0] : vector<128x128xf32> to vector<128xf32>
      %21 = vector.shape_cast %20 : vector<128xf32> to vector<1x128xf32>
      %22 = arith.addf %19, %21 : vector<1x128xf32>
      %c0_20 = arith.constant 0 : index
      %c0_21 = arith.constant 0 : index
      %23 = vector.load %arg6[%c0_20, %c0_21] : memref<1x128xf32, #tpu.memory_space<vmem>>, vector<1x128xf32>
      tpu.vector_store %arg6[%c0_20, %c0_21], %22 {strides = array<i32>} : memref<1x128xf32, #tpu.memory_space<vmem>>, vector<1x128xf32>,
      %c0_22 = arith.constant 0 : index
      %c0_23 = arith.constant 0 : index
      %24 = vector.load %arg7[%c0_22, %c0_23] : memref<1x128xf32, #tpu.memory_space<vmem>>, vector<1x128xf32>
      %25 = arith.mulf %17, %17 : vector<128x128xf32>
      %cst_24 = arith.constant dense<0.000000e+00> : vector<128xf32>
      %26 = vector.multi_reduction <add>, %25, %cst_24 [0] : vector<128x128xf32> to vector<128xf32>
      %27 = vector.shape_cast %26 : vector<128xf32> to vector<1x128xf32>
      %28 = arith.addf %24, %27 : vector<1x128xf32>
      %c0_25 = arith.constant 0 : index
      %c0_26 = arith.constant 0 : index
      %29 = vector.load %arg7[%c0_25, %c0_26] : memref<1x128xf32, #tpu.memory_space<vmem>>, vector<1x128xf32>
      tpu.vector_store %arg7[%c0_25, %c0_26], %28 {strides = array<i32>} : memref<1x128xf32, #tpu.memory_space<vmem>>, vector<1x128xf32>,
    } else {
    }
    return
  }
  func.func @transform_0(%arg0: i32, %arg1: i32, %arg2: i32) -> (i32, i32) {
    %c0_i32 = arith.constant 0 : i32
    return %arg1, %arg2 : i32, i32
  }
  func.func @transform_1(%arg0: i32, %arg1: i32, %arg2: i32) -> (i32, i32) {
    %c0_i32 = arith.constant 0 : i32
    return %arg2, %arg0 : i32, i32
  }
  func.func @transform_2(%arg0: i32, %arg1: i32, %arg2: i32) -> (i32, i32) {
    %c0_i32 = arith.constant 0 : i32
    return %arg1, %arg0 : i32, i32
  }
  func.func @transform_3(%arg0: i32, %arg1: i32, %arg2: i32) -> (i32, i32) {
    %c0_i32 = arith.constant 0 : i32
    %c0_i32_0 = arith.constant 0 : i32
    return %c0_i32, %arg0 : i32, i32
  }
  func.func @transform_4(%arg0: i32, %arg1: i32, %arg2: i32) -> (i32, i32) {
    %c0_i32 = arith.constant 0 : i32
    %c0_i32_0 = arith.constant 0 : i32
    return %c0_i32, %arg0 : i32, i32
  }
}

</mosaic_0001>

<bundles_post_ra>
// kernel: tpu_custom_call.1
= control target key start
LH: loop header
LB: loop body
LE: loop exit
PB: predicated region body
PF: predicated region fallthrough
CT: control target
= control target key end

     0   :  { %10 = vsyncpa [#allocation4], 0  ;;  %s1256_s0 = inlined_call_operand.vmem [shape: bf16[128,288], index: 0, kind: input, shape index: {}]   ;;  %s1257_s1 = inlined_call_operand.vmem [shape: bf16[288,128], index: 1, kind: input, shape index: {}]   ;;  %s1258_s2 = inlined_call_operand.hbm [shape: f32[128,128], index: 2, kind: output, shape index: {0}]   ;;  %s1259_s3 = inlined_call_operand.hbm [shape: f32[1,128], index: 3, kind: output, shape index: {1}]   ;;  %s1260_s4 = inlined_call_operand.hbm [shape: f32[1,128], index: 4, kind: output, shape index: {2}]  }
   0x1   :  { %v915_v0 = vld [vmem:[%s1257_s1 + $0x40] sm:$0xff]   ;;  %v917_v2 = vld [vmem:[%s1257_s1 + $0x48] sm:$0xff]   ;;  %v919_v4 = vld [vmem:[%s1257_s1 + $0x50] sm:$0xff]  }
   0x2   :  { %v916_v1 = vld [vmem:[%s1257_s1] sm:$0xff]   ;;  %799 = vmatprep.subr.bf16.mxu0 %v915_v0  ;;  %893 = vmatprep.subr.bf16.mxu1 %v915_v0  ;;  %v918_v3 = vld [vmem:[%s1257_s1 + $0x8] sm:$0xff]   ;;  %v920_v5 = vld [vmem:[%s1257_s1 + $0x10] sm:$0xff]  }
   0x3   :  { %800 = vmatpush3.bf16.msra.mxu0 %v916_v1  ;;  %901 = vmatpush3.bf16.msra.mxu1 %v916_v1  ;;  %v921_v6 = vld [vmem:[%s1257_s1 + $0x58] sm:$0xff]   ;;  %v923_v8 = vld [vmem:[%s1257_s1 + $0x60] sm:$0xff]   ;;  %v925_v10 = vld [vmem:[%s1257_s1 + $0x68] sm:$0xff]  }
   0x4   :  { %801 = vmatprep.subr.bf16.mxu0 %v917_v2  ;;  %894 = vmatprep.subr.bf16.mxu1 %v917_v2  ;;  %v922_v7 = vld [vmem:[%s1257_s1 + $0x18] sm:$0xff]   ;;  %v924_v9 = vld [vmem:[%s1257_s1 + $0x20] sm:$0xff]   ;;  %v926_v13 = vld [vmem:[%s1257_s1 + $0x28] sm:$0xff]  }
   0x5   :  { %v933_v11 = vld [vmem:[%s1256_s0 + $0x4] ss:$12 sps:$4 sm:$0xff]   ;;  %v936_v12 = vld [vmem:[%s1256_s0 + $0x94] ss:$12 sps:$4 sm:$0xff]   ;;  %v929_v16 = vld [vmem:[%s1257_s1 + $0x78] sm:$0xff]  }
   0x6   :  { %v927_v14 = vld [vmem:[%s1257_s1 + $0x70] sm:$0xff]   ;;  %406 = vmatprep.mubr.bf16.mxu0 %v933_v11  ;;  %454 = vmatprep.mubr.bf16.mxu1 %v936_v12  ;;  %v930_v17 = vld [vmem:[%s1257_s1 + $0x38] sm:$0xff]   ;;  %v931_v18 = vld [vmem:[%s1256_s0] ss:$12 sps:$4 sm:$0xff]  }
   0x7   :  { %802 = vmatpush3.bf16.msra.mxu0 %v918_v3  ;;  %902 = vmatpush3.bf16.msra.mxu1 %v918_v3  ;;  %v928_v15 = vld [vmem:[%s1257_s1 + $0x30] sm:$0xff]   ;;  %v937_v19 = vld [vmem:[%s1257_s1 + $0x80] sm:$0xff]   ;;  %v938_v21 = vld [vmem:[%s1256_s0 + $0x1c] ss:$12 sps:$4 sm:$0xff]  }
   0x8   :  { %803 = vmatprep.subr.bf16.mxu0 %v919_v4  ;;  %895 = vmatprep.subr.bf16.mxu1 %v919_v4  ;;  %v934_v20 = vld [vmem:[%s1256_s0 + $0x90] ss:$12 sps:$4 sm:$0xff]   ;;  %v940_v22 = vld [vmem:[%s1256_s0 + $0xac] ss:$12 sps:$4 sm:$0xff]  }
   0x9   :  { %v944_v23 = vld [vmem:[%s1257_s1 + $0x88] sm:$0xff]  }
   0xb   :  { %804 = vmatpush3.bf16.msra.mxu0 %v920_v5  ;;  %903 = vmatpush3.bf16.msra.mxu1 %v920_v5 }
   0xc   :  { %805 = vmatprep.subr.bf16.mxu0 %v921_v6  ;;  %896 = vmatprep.subr.bf16.mxu1 %v921_v6 }
   0xf   :  { %806 = vmatpush3.bf16.msra.mxu0 %v922_v7  ;;  %904 = vmatpush3.bf16.msra.mxu1 %v922_v7 }
  0x10   :  { %807 = vmatprep.subr.bf16.mxu0 %v923_v8  ;;  %897 = vmatprep.subr.bf16.mxu1 %v923_v8 }
  0x13   :  { %808 = vmatpush3.bf16.msra.mxu0 %v924_v9  ;;  %905 = vmatpush3.bf16.msra.mxu1 %v924_v9 }
  0x14   :  { %809 = vmatprep.subr.bf16.mxu0 %v925_v10  ;;  %898 = vmatprep.subr.bf16.mxu1 %v925_v10 }
  0x17   :  { %810 = vmatpush3.bf16.msra.mxu0 %v926_v13  ;;  %906 = vmatpush3.bf16.msra.mxu1 %v926_v13 }
  0x18   :  { %811 = vmatprep.subr.bf16.mxu0 %v927_v14  ;;  %899 = vmatprep.subr.bf16.mxu1 %v927_v14 }
  0x1b   :  { %812 = vmatpush3.bf16.msra.mxu0 %v928_v15  ;;  %907 = vmatpush3.bf16.msra.mxu1 %v928_v15 }
  0x1c   :  { %813 = vmatprep.subr.bf16.mxu0 %v929_v16  ;;  %900 = vmatprep.subr.bf16.mxu1 %v929_v16 }
  0x1f   :  { %814 = vmatpush3.bf16.msra.mxu0 %v930_v17  ;;  %908 = vmatpush3.bf16.msra.mxu1 %v930_v17 }
  0x20   :  { %873 = vmatprep.subr.bf16.mxu1 %v937_v19 }
  0x22   :  { %407 = vmatmul.mubr.bf16.vlgmr.msra.gmra.mrb[0].mxu0 %v931_v18  ;;  %455 = vmatmul.mubr.bf16.vlgmr.msra.gmra.mrb[0].mxu1 %v934_v20 }
  0x23   :  { %874 = vmatpush3.bf16.msra.mxu1 %v937_v19  ;;  %414 = vmatprep.mubr.bf16.mxu0 %v938_v21 }
  0x24   :  { %462 = vmatprep.mubr.bf16.mxu1 %v940_v22  ;;  %875 = vmatprep.subr.bf16.mxu1 %v944_v23 }
  0x25   :  { %11 = vsyncpa [#allocation6], 0  ;;  %v942_v24 = vld [vmem:[%s1256_s0 + $0x18] ss:$12 sps:$4 sm:$0xff]   ;;  %v943_v25 = vld [vmem:[%s1256_s0 + $0xa8] ss:$12 sps:$4 sm:$0xff]  }
  0x26   :  { %v945_v26 = vld [vmem:[%s1256_s0 + $0x34] ss:$12 sps:$4 sm:$0xff]   ;;  %vm349_vm0 = vcmask 261120   ;;  %v948_v28 = vld [vmem:[%s1256_s0 + $0x30] ss:$12 sps:$4 sm:$0xff]   ;;  %v1035_v42 = vmov 0.0  }
  0x27   :  { %876 = vmatpush3.bf16.msra.mxu1 %v944_v23  ;;  %v947_v27 = vld [vmem:[%s1256_s0 + $0x8] ss:$12 sps:$4 sm:$0xff]   ;;  %v949_v29 = vld [vmem:[%s1256_s0 + $0x20] ss:$12 sps:$4 sm:$0xff]   ;;  %v952_v31 = vld [vmem:[%s1256_s0 + $0x38] ss:$12 sps:$4 sm:$0xff]  }
  0x28   :  { %v950_v30 = vld [vmem:[%s1256_s0 + $0x4c] ss:$12 sps:$4 sm:$0xff]   ;;  %v953_v32 = vld [vmem:[%s1256_s0 + $0x48] ss:$12 sps:$4 sm:$0xff]   ;;  %v954_v33 = vld [vmem:[%s1256_s0 + $0x50] ss:$12 sps:$4 sm:$0xff]  }
  0x29   :  { %v955_v34 = vld [vmem:[%s1256_s0 + $0x64] ss:$12 sps:$4 sm:$0xff]   ;;  %v957_v35 = vld [vmem:[%s1256_s0 + $0x68] ss:$12 sps:$4 sm:$0xff]   ;;  %v958_v36 = vld [vmem:[%s1256_s0 + $0x60] ss:$12 sps:$4 sm:$0xff]  }
  0x2a   :  { %415 = vmatmul.mubr.bf16.gmra.mrb[4].mxu0 %v942_v24  ;;  %463 = vmatmul.mubr.bf16.gmra.mrb[4].mxu1 %v943_v25  ;;  %v959_v37 = vld [vmem:[%s1256_s0 + $0x80] ss:$12 sps:$4 sm:$0xff]   ;;  %v960_v38 = vld [vmem:[%s1256_s0 + $0x7c] ss:$12 sps:$4 sm:$0xff]   ;;  %v962_v39 = vld [vmem:[%s1256_s0 + $0x98] ss:$12 sps:$4 sm:$0xff]  }
  0x2b   :  { %422 = vmatprep.mubr.bf16.mxu0 %v945_v26  ;;  %877 = vmatprep.mubr.msk.bf16.mxu1 %vm349_vm0, %v947_v27  ;;  %v963_v40 = vld [vmem:[%s1256_s0 + $0x78] ss:$12 sps:$4 sm:$0xff]   ;;  %v964_v41 = vld [vmem:[%s1256_s0 + $0xb0] ss:$12 sps:$4 sm:$0xff]   ;;  %605 = vst [vmem:[#allocation5] sm:$0x1] %v1035_v42 }
  0x2c   :  { %606 = vst [vmem:[#allocation7] sm:$0x1] %v1035_v42  ;;  %s1036_s0 = smov [#allocation3]  }
  0x2d   :  { %s711_s19 = sshll.u32 %s1036_s0, 4  ;;  %s712_s19 = int_to_ptr.vmem [resolvable:$true] %s711_s19 }
  0x2e   :  { %s965_s20 = scalar_lea.vmem %s712_s19, 2048  ;;  %p970_p1 = scmp.lt.s32.totalorder %s712_s19, %s712_s19 }
  0x2f   :  { %p966_p0 = scmp.ne.s32.totalorder %s712_s19, %s965_s20  ;;  %p971_p2 = scmp.lt.s32.totalorder %s965_s20, %s965_s20 }
  0x31   :  { %p972_p3 = por %p971_p2, %p970_p1 }
  0x32   :  { %423 = vmatmul.mubr.bf16.gmra.mrb[8].mxu0 %v948_v28  ;;  %878 = vmatmul.mubr.msk.bf16.vlgmr.msra.gmra.mrb[8].mxu1 %vm349_vm0, %v949_v29 }
  0x33   :  { %430 = vmatprep.mubr.bf16.mxu0 %v950_v30  ;;  %881 = vmatprep.mubr.msk.bf16.mxu1 %vm349_vm0, %v952_v31  ;;  %p973_p4 = pnand %p972_p3, %p966_p0 }
  0x3a   :  { %431 = vmatmul.mubr.bf16.gmra.mrb[12].mxu0 %v953_v32  ;;  %882 = vmatmul.mubr.msk.bf16.gmra.mrb[12].mxu1 %vm349_vm0, %v954_v33 }
  0x3b   :  { %438 = vmatprep.mubr.bf16.mxu0 %v955_v34  ;;  %885 = vmatprep.mubr.msk.bf16.mxu1 %vm349_vm0, %v957_v35 }
  0x42   :  { %439 = vmatmul.mubr.bf16.gmra.mrb[16].mxu0 %v958_v36  ;;  %886 = vmatmul.mubr.msk.bf16.gmra.mrb[16].mxu1 %vm349_vm0, %v959_v37 }
  0x43   :  { %446 = vmatprep.mubr.bf16.mxu0 %v960_v38  ;;  %889 = vmatprep.mubr.msk.bf16.mxu1 %vm349_vm0, %v962_v39 }
  0x4a   :  { %447 = vmatmul.mubr.bf16.gmra.mrb[20].mxu0 %v963_v40  ;;  %890 = vmatmul.mubr.msk.bf16.gmra.mrb[20].mxu1 %vm349_vm0, %v964_v41 }
  0xf5   :  { %v815_v43 = vpop.f32.mrb[0].mxu0  ;;  %v851_v44 = vpop.f32.mrb[0].mxu1 }
  0xf6   :  { %v816_v45 = vpop.f32.mrb[1].mxu0  ;;  %v852_v46 = vpop.f32.mrb[1].mxu1 }
  0xf7   :  { %v817_v47 = vadd.f32 %v816_v45, %v815_v43  ;;  %v818_v48 = vpop.f32.mrb[2].mxu0  ;;  %v1200_v49 = vadd.f32 %v852_v46, %v851_v44  ;;  %v854_v50 = vpop.f32.mrb[2].mxu1 }
  0xf8   :  { %v819_v51 = vpop.f32.mrb[3].mxu0  ;;  %v855_v52 = vpop.f32.mrb[3].mxu1 }
  0xf9   :  { %v820_v53 = vadd.f32 %v819_v51, %v818_v48  ;;  %v1202_v54 = vadd.f32 %v855_v52, %v854_v50 }
  0xfd   :  { %v821_v55 = vpop.f32.mrb[4].mxu0  ;;  %v857_v56 = vpop.f32.mrb[4].mxu1 }
  0xfe   :  { %v822_v57 = vpop.f32.mrb[5].mxu0  ;;  %v858_v58 = vpop.f32.mrb[5].mxu1 }
  0xff   :  { %v823_v59 = vadd.f32 %v822_v57, %v821_v55  ;;  %v824_v60 = vpop.f32.mrb[6].mxu0  ;;  %v1204_v61 = vadd.f32 %v858_v58, %v857_v56  ;;  %v860_v62 = vpop.f32.mrb[6].mxu1 }
 0x100   :  { %v825_v63 = vpop.f32.mrb[7].mxu0  ;;  %v861_v0 = vpop.f32.mrb[7].mxu1 }
 0x101   :  { %v826_v1 = vadd.f32 %v825_v63, %v824_v60  ;;  %v1206_v2 = vadd.f32 %v861_v0, %v860_v62 }
 0x105   :  { %v827_v3 = vpop.f32.mrb[8].mxu0  ;;  %v879_v4 = vpop.f32.mrb[8].mxu1 }
 0x106   :  { %v514_v5 = vadd.f32 %v879_v4, %v823_v59  ;;  %v828_v6 = vpop.f32.mrb[9].mxu0  ;;  %v505_v7 = vpop.f32.mrb[9].mxu1 }
 0x107   :  { %v829_v8 = vadd.f32 %v828_v6, %v827_v3  ;;  %v506_v9 = vadd.f32 %v817_v47, %v505_v7  ;;  %v830_v10 = vpop.f32.mrb[10].mxu0  ;;  %v880_v11 = vpop.f32.mrb[10].mxu1 }
 0x108   :  { %628 = vst [vmem:[#allocation3 + $0x10] sm:$0xff] %v514_v5  ;;  %v517_v12 = vadd.f32 %v880_v11, %v826_v1  ;;  %v831_v13 = vpop.f32.mrb[11].mxu0  ;;  %v508_v14 = vpop.f32.mrb[11].mxu1  ;;  %v669_v20 = vmul.f32 %v514_v5, %v514_v5 }
 0x109   :  { %626 = vst [vmem:[#allocation3] sm:$0xff] %v506_v9  ;;  %v832_v15 = vadd.f32 %v831_v13, %v830_v10  ;;  %v509_v16 = vadd.f32 %v820_v53, %v508_v14  ;;  %v667_v17 = vmul.f32 %v506_v9, %v506_v9 }
 0x10a   :  { %629 = vst [vmem:[#allocation3 + $0x18] sm:$0xff] %v517_v12  ;;  %v670_v25 = vmul.f32 %v517_v12, %v517_v12 }
 0x10b   :  { %627 = vst [vmem:[#allocation3 + $0x8] sm:$0xff] %v509_v16  ;;  %v643_v18 = vadd.f32 %v509_v16, %v506_v9  ;;  %v668_v19 = vmul.f32 %v509_v16, %v509_v16 }
 0x10d   :  { %v644_v21 = vadd.f32 %v643_v18, %v514_v5  ;;  %v683_v22 = vadd.f32 %v668_v19, %v667_v17  ;;  %v833_v23 = vpop.f32.mrb[12].mxu0  ;;  %v883_v24 = vpop.f32.mrb[12].mxu1 }
 0x10e   :  { %v834_v26 = vpop.f32.mrb[13].mxu0  ;;  %v521_v27 = vpop.f32.mrb[13].mxu1 }
 0x10f   :  { %v684_v28 = vadd.f32 %v683_v22, %v669_v20  ;;  %v835_v29 = vadd.f32 %v834_v26, %v833_v23  ;;  %v522_v30 = vadd.f32 %v829_v8, %v521_v27  ;;  %v645_v31 = vadd.f32 %v644_v21, %v517_v12  ;;  %v836_v32 = vpop.f32.mrb[14].mxu0  ;;  %v884_v33 = vpop.f32.mrb[14].mxu1 }
 0x110   :  { %v837_v34 = vpop.f32.mrb[15].mxu0  ;;  %v524_v35 = vpop.f32.mrb[15].mxu1 }
 0x111   :  { %v530_v36 = vadd.f32 %v883_v24, %v835_v29  ;;  %630 = vst [vmem:[#allocation3 + $0x20] sm:$0xff] %v522_v30  ;;  %v646_v37 = vadd.f32 %v645_v31, %v522_v30  ;;  %v671_v38 = vmul.f32 %v522_v30, %v522_v30  ;;  %v685_v39 = vadd.f32 %v684_v28, %v670_v25 }
 0x112   :  { %v838_v40 = vadd.f32 %v837_v34, %v836_v32  ;;  %v525_v41 = vadd.f32 %v832_v15, %v524_v35 }
 0x113   :  { %632 = vst [vmem:[#allocation3 + $0x30] sm:$0xff] %v530_v36  ;;  %v686_v42 = vadd.f32 %v685_v39, %v671_v38  ;;  %v673_v48 = vmul.f32 %v530_v36, %v530_v36 }
 0x114   :  { %v533_v43 = vadd.f32 %v884_v33, %v838_v40  ;;  %631 = vst [vmem:[#allocation3 + $0x28] sm:$0xff] %v525_v41  ;;  %v647_v44 = vadd.f32 %v646_v37, %v525_v41  ;;  %v672_v45 = vmul.f32 %v525_v41, %v525_v41 }
 0x115   :  { %v839_v46 = vpop.f32.mrb[16].mxu0  ;;  %v887_v47 = vpop.f32.mrb[16].mxu1 }
 0x116   :  { %633 = vst [vmem:[#allocation3 + $0x38] sm:$0xff] %v533_v43  ;;  %v648_v50 = vadd.f32 %v647_v44, %v530_v36  ;;  %v687_v51 = vadd.f32 %v686_v42, %v672_v45  ;;  %v840_v52 = vpop.f32.mrb[17].mxu0  ;;  %v537_v53 = vpop.f32.mrb[17].mxu1  ;;  %v674_v58 = vmul.f32 %v533_v43, %v533_v43 }
 0x117   :  { %v841_v55 = vadd.f32 %v840_v52, %v839_v46  ;;  %v842_v56 = vpop.f32.mrb[18].mxu0  ;;  %v888_v57 = vpop.f32.mrb[18].mxu1 }
 0x118   :  { %v688_v59 = vadd.f32 %v687_v51, %v673_v48  ;;  %v843_v60 = vpop.f32.mrb[19].mxu0  ;;  %v649_v62 = vadd.f32 %v648_v50, %v533_v43  ;;  %v540_v63 = vpop.f32.mrb[19].mxu1 }
 0x119   :  { %v844_v0 = vadd.f32 %v843_v60, %v842_v56  ;;  %v538_v1 = vadd.f32 %v841_v55, %v537_v53 }
 0x11a   :  { %v689_v3 = vadd.f32 %v688_v59, %v674_v58 }
 0x11b   :  { %634 = vst [vmem:[#allocation3 + $0x40] sm:$0xff] %v538_v1  ;;  %v650_v4 = vadd.f32 %v649_v62, %v538_v1  ;;  %v675_v5 = vmul.f32 %v538_v1, %v538_v1  ;;  %v541_v6 = vadd.f32 %v844_v0, %v540_v63 }
 0x11d   :  { %v690_v7 = vadd.f32 %v689_v3, %v675_v5  ;;  %635 = vst [vmem:[#allocation3 + $0x48] sm:$0xff] %v541_v6  ;;  %v651_v8 = vadd.f32 %v650_v4, %v541_v6  ;;  %v676_v9 = vmul.f32 %v541_v6, %v541_v6  ;;  %v845_v10 = vpop.f32.mrb[20].mxu0  ;;  %v891_v11 = vpop.f32.mrb[20].mxu1 }
 0x11e   :  { %v562_v12 = vadd.f32 %v891_v11, %v1204_v61  ;;  %v846_v13 = vpop.f32.mrb[21].mxu0  ;;  %v553_v14 = vpop.f32.mrb[21].mxu1 }
 0x11f   :  { %v691_v15 = vadd.f32 %v690_v7, %v676_v9  ;;  %v847_v16 = vadd.f32 %v846_v13, %v845_v10  ;;  %v554_v17 = vadd.f32 %v1200_v49, %v553_v14  ;;  %v848_v18 = vpop.f32.mrb[22].mxu0  ;;  %v892_v19 = vpop.f32.mrb[22].mxu1 }
 0x120   :  { %640 = vst [vmem:[#allocation3 + $0x70] sm:$0xff] %v562_v12  ;;  %v565_v20 = vadd.f32 %v892_v19, %v1206_v2  ;;  %v849_v21 = vpop.f32.mrb[23].mxu0  ;;  %v556_v22 = vpop.f32.mrb[23].mxu1 }
 0x121   :  { %v546_v23 = vadd.f32 %v887_v47, %v847_v16  ;;  %638 = vst [vmem:[#allocation3 + $0x60] sm:$0xff] %v554_v17  ;;  %v850_v24 = vadd.f32 %v849_v21, %v848_v18  ;;  %v557_v61 = vadd.f32 %v1202_v54, %v556_v22 }
 0x122   :  { %641 = vst [vmem:[#allocation3 + $0x78] sm:$0xff] %v565_v20 }
 0x123   :  { %636 = vst [vmem:[#allocation3 + $0x50] sm:$0xff] %v546_v23  ;;  %v652_v25 = vadd.f32 %v651_v8, %v546_v23  ;;  %v677_v26 = vmul.f32 %v546_v23, %v546_v23  ;;  %v549_v49 = vadd.f32 %v888_v57, %v850_v24  ;;  %639 = vst [vmem:[#allocation3 + $0x68] sm:$0xff] %v557_v61 }
 0x125   :  { %v692_v27 = vadd.f32 %v691_v15, %v677_v26  ;;  %637 = vst [vmem:[#allocation3 + $0x58] sm:$0xff] %v549_v49  ;;  %v653_v28 = vadd.f32 %v652_v25, %v549_v49  ;;  %v678_v29 = vmul.f32 %v549_v49, %v549_v49 }
 0x126   :  { %976 = shalt.err (!%p973_p4)
}
 0x127   :  { %s977_s23 = scalar_lea.hbm %s1258_s2, 2048 }
 0x128   :  { %p978_p5 = scmp.ne.s32.totalorder %s1258_s2, %s977_s23  ;;  %p981_p6 = scmp.lt.u32.totalorder %s977_s23, %s1258_s2 }
 0x12a   :  { %p983_p7 = pnand %p981_p6, %p978_p5 }
 0x12c   :  { %986 = shalt.err (!%p983_p7)
}
 0x12d   :  { %s1037_s28 = smov 128   ;;  %s1038_s29 = smov 8   ;;  %v679_v54 = vmul.f32 %v554_v17, %v554_v17  ;;  %v693_v2 = vadd.f32 %v692_v27, %v678_v29  ;;  %v654_v30 = vadd.f32 %v653_v28, %v554_v17  ;;  %v680_v32 = vmul.f32 %v557_v61, %v557_v61  ;;  %v642_v51 = vld [vmem:[#allocation5] sm:$0x1]  ;;  %v666_v55 = vld [vmem:[#allocation7] sm:$0x1] }
 0x12e   :  { %717 = dma.vmem_to_hbm [thread:$0]  %s712_s19, 2048, %s1258_s2, [#allocation4], %s1037_s28, %s1037_s28, %s1038_s29   ;;  %v681_v34 = vmul.f32 %v562_v12, %v562_v12  ;;  %v682_v37 = vmul.f32 %v565_v20, %v565_v20 }
 0x12f   :  { %v655_v31 = vadd.f32 %v654_v30, %v557_v61  ;;  %v694_v33 = vadd.f32 %v693_v2, %v679_v54  ;;  %s1039_s2 = smov [#allocation5]   ;;  %s1040_s7 = smov [#allocation7]  }
 0x130   :  { %s724_s6 = sshll.u32 %s1039_s2, 4  ;;  %s734_s8 = sshll.u32 %s1040_s7, 4  ;;  %s725_s6 = int_to_ptr.vmem [resolvable:$true] %s724_s6  ;;  %s1224_s8 = int_to_ptr.vmem [resolvable:$true] %s734_s8 }
 0x131   :  { %v656_v35 = vadd.f32 %v655_v31, %v562_v12  ;;  %v695_v36 = vadd.f32 %v694_v33, %v680_v32  ;;  %s987_s9 = scalar_lea.vmem %s725_s6, 16  ;;  %s991_s10 = scalar_lea.vmem %s725_s6, 32 }
 0x132   :  { %p988_p8 = scmp.ne.s32.totalorder %s725_s6, %s987_s9  ;;  %p992_p9 = scmp.lt.s32.totalorder %s725_s6, %s725_s6 }
 0x133   :  { %v657_v38 = vadd.f32 %v656_v35, %v565_v20  ;;  %v696_v39 = vadd.f32 %v695_v36, %v681_v34  ;;  %p993_p10 = scmp.lt.s32.totalorder %s991_s10, %s987_s9 }
 0x135   :  { %v658_v40 = vrot.slane %v657_v38, 4  ;;  %v697_v41 = vadd.f32 %v696_v39, %v682_v37  ;;  %p994_p11 = por %p993_p10, %p992_p9 }
 0x137   :  { %v659_v42 = vadd.f32 %v658_v40, %v657_v38  ;;  %v698_v43 = vrot.slane %v697_v41, 4  ;;  %p995_p12 = pnand %p994_p11, %p988_p8 }
 0x139   :  { %v660_v44 = vrot.slane %v659_v42, 2  ;;  %v699_v45 = vadd.f32 %v698_v43, %v697_v41 }
 0x13b   :  { %v661_v46 = vadd.f32 %v660_v44, %v659_v42  ;;  %v700_v47 = vrot.slane %v699_v45, 2 }
 0x13d   :  { %v662_v48 = vrot.slane %v661_v46, 1  ;;  %v701_v50 = vadd.f32 %v700_v47, %v699_v45 }
 0x13f   :  { %v663_v52 = vadd.f32 %v662_v48, %v661_v46  ;;  %v702_v53 = vrot.slane %v701_v50, 1 }
 0x141   :  { %v664_v56 = vadd.f32 %v663_v52, %v642_v51  ;;  %v703_v57 = vadd.f32 %v702_v53, %v701_v50 }
 0x143   :  { %665 = vst [vmem:[#allocation5] sm:$0x1] %v664_v56  ;;  %v704_v58 = vadd.f32 %v703_v57, %v666_v55 }
 0x144   :  { %998 = shalt.err (!%p995_p12)
}
 0x145   :  { %s999_s13 = scalar_lea.hbm %s1259_s3, 16 }
 0x146   :  { %p1000_p13 = scmp.ne.s32.totalorder %s1259_s3, %s999_s13  ;;  %p1003_p0 = scmp.lt.u32.totalorder %s999_s13, %s1259_s3 }
 0x148   :  { %p1005_p1 = pnand %p1003_p0, %p1000_p13 }
 0x14a   :  { %1008 = shalt.err (!%p1005_p1)
}
 0x14b   :  { %727 = dma.vmem_to_hbm [thread:$0]  %s725_s6, 16, %s1259_s3, [#allocation6]   ;;  %705 = vst [vmem:[#allocation7] sm:$0x1] %v704_v58 }
 0x14c   :  { %s1009_s0 = scalar_lea.vmem %s1224_s8, 16  ;;  %s1013_s19 = scalar_lea.vmem %s1224_s8, 32 }
 0x14d   :  { %p1010_p2 = scmp.ne.s32.totalorder %s1224_s8, %s1009_s0  ;;  %p1014_p3 = scmp.lt.s32.totalorder %s1224_s8, %s1224_s8 }
 0x14e   :  { %p1015_p4 = scmp.lt.s32.totalorder %s1013_s19, %s1009_s0 }
 0x150   :  { %p1016_p5 = por %p1015_p4, %p1014_p3 }
 0x152   :  { %p1017_p6 = pnand %p1016_p5, %p1010_p2 }
 0x154   :  { %1020 = shalt.err (!%p1017_p6)
}
 0x155   :  { %s1021_s22 = scalar_lea.hbm %s1260_s4, 16 }
 0x156   :  { %p1022_p7 = scmp.ne.s32.totalorder %s1260_s4, %s1021_s22  ;;  %p1025_p8 = scmp.lt.u32.totalorder %s1021_s22, %s1260_s4 }
 0x158   :  { %p1027_p9 = pnand %p1025_p8, %p1022_p7 }
 0x15a   :  { %1030 = shalt.err (!%p1027_p9)
}
 0x15b   :  { %737 = dma.vmem_to_hbm [thread:$0]  %s1224_s8, 16, %s1260_s4, [#allocation6]  }
 0x15c   :  { %1031 = dma.done.wait [#allocation4], 2048  }
 0x15d   :  { %1032 = vsyncadd [#allocation4], 4294965248 }
 0x15e   :  { %1033 = dma.done.wait [#allocation6], 32  }
 0x15f   :  { %1034 = vsyncadd [#allocation6], 4294967264 }
 0x160   :  { %747 = vsyncpa [#allocation4], 1 }
 0x161   :  { %748 = vsyncpa [#allocation6], 1 }

</bundles_post_ra>
